<compile_context>
chip_gen: v5e
topology: v5e:2x2
jax: 0.10.0
libtpu: 0.0.40
codegen_flags: <defaults>
</compile_context>

<pallas_src>
import jax
import jax.numpy as jnp
from jax.experimental import pallas as pl
from jax.experimental.pallas import tpu as pltpu


# --------------------------------------------------------------------------- #
# Kernel
# --------------------------------------------------------------------------- #
def _make_kernel(L, C, flat_io):
    def kernel(x_ref,
               tw1_ref, tb1_ref, tw2_ref, tb2_ref,
               cw1_ref, cb1_ref, cw2_ref, cb2_ref,
               o_ref):
        bt = x_ref.shape[0]
        f32 = jnp.float32

        def mm(a, w_ref):
            # bf16 MXU matmul with f32 accumulation (weights already bf16).
            return jnp.dot(a.astype(jnp.bfloat16), w_ref[...],
                           preferred_element_type=f32)

        x = x_ref[...].astype(f32)
        x3 = x.reshape(bt, L, C) if flat_io else x                  # (bt, L, C)

        # ---- temporal mixing on x^T; batch folded into the matmul M dim ----
        xt = jnp.swapaxes(x3, 1, 2).reshape(bt * C, L)              # (bt*C, L)
        h = jnp.maximum(mm(xt, tw1_ref) + tb1_ref[...], 0.0)        # (bt*C, D)
        u = xt + mm(h, tw2_ref) + tb2_ref[...]                      # (bt*C, L)
        # TODO(synk): dropout omitted (eval-mode identity).

        # ---- channel mixing; batch folded into the matmul M dim ------------
        v = jnp.swapaxes(u.reshape(bt, C, L), 1, 2).reshape(bt * L, C)  # (bt*L, C)
        h2 = jnp.maximum(mm(v, cw1_ref) + cb1_ref[...], 0.0)        # (bt*L, D)
        w = v + mm(h2, cw2_ref) + cb2_ref[...]                      # (bt*L, C)

        if flat_io:
            o_ref[...] = w.reshape(bt, L * C).astype(o_ref.dtype)   # lane-dense store
        else:
            o_ref[...] = w.reshape(bt, L, C).astype(o_ref.dtype)
    return kernel


# --------------------------------------------------------------------------- #
# Padding-aware, generation-aware tiling policy
# --------------------------------------------------------------------------- #
def _round_up(n, m):
    return ((n + m - 1) // m) * m


def _padded_bytes(rows, cols, itemsize, sublane=8):
    """VMEM footprint of a 2-D tile: lane dim -> mult of 128, sublane -> mult of `sublane`."""
    return (_round_up(max(int(rows), 1), sublane)
            * _round_up(max(int(cols), 1), 128) * itemsize)


def _vmem_capacity_bytes():
    try:
        cap = int(getattr(pltpu.get_tpu_info(), "vmem_capacity_bytes", 0) or 0)
        if cap > 0:
            return cap
    except Exception:
        pass
    return 64 << 20      # conservative fallback: v7x per-core physical VMEM


def _min_grid_steps():
    # Only v7x has 2 TensorCores per chip worth feeding via the "parallel" grid
    # axis; on v5e/v6e splitting the grid is pure per-step overhead.
    try:
        kind = (jax.devices()[0].device_kind or "").lower()
        if "v7" in kind:
            return 2
    except Exception:
        pass
    return 1


def _weights_vmem_bytes(L, C, D, buffers):
    wb = (_padded_bytes(L, D, 2, 16) + _padded_bytes(D, L, 2, 16)
          + _padded_bytes(C, D, 2, 16) + _padded_bytes(D, C, 2, 16))   # bf16
    bb = (_padded_bytes(1, D, 4) * 2 + _padded_bytes(1, L, 4)
          + _padded_bytes(1, C, 4))                                    # f32
    return buffers * (wb + bb)


def _step_vmem_bytes(bt, L, C, D, flat_io):
    # x / out blocks, double-buffered by the pipeline.
    if flat_io:
        io = 2 * 2 * _padded_bytes(bt, L * C, 4)
    else:
        io = 2 * 2 * bt * _padded_bytes(L, C, 4)
    # Live f32 intermediates (xt, h, u, v, h2, w) + 50% slack for bf16 operand
    # copies and relayout temporaries.
    live = (2 * _padded_bytes(bt * C, L, 4) + _padded_bytes(bt * C, D, 4)
            + 2 * _padded_bytes(bt * L, C, 4) + _padded_bytes(bt * L, D, 4))
    return io + int(1.5 * live)


def _pick_batch_tile(B, L, C, D, budget, min_steps, flat_io):
    # Divisors of B keeping the block's sublane dim friendly: the full batch
    # (block == array dim) or a multiple of 8.
    cands = [bt for bt in range(1, B + 1)
             if B % bt == 0 and (bt == B or bt % 8 == 0)]
    fits = [bt for bt in cands if _step_vmem_bytes(bt, L, C, D, flat_io) <= budget]
    if not fits:
        return cands[0]
    split = [bt for bt in fits if B // bt >= min_steps]
    return max(split) if split else max(fits)


# --------------------------------------------------------------------------- #
# Wrapper
# --------------------------------------------------------------------------- #
def resblock(x, params, *, batch_tile=None, flat_io=True, single_buffer_consts=True):
    """x: (B, L, C) float32.  params: dict of pre-transposed weights / biases."""
    B, L, C = x.shape
    D = params["tw1"].shape[1]

    cap = _vmem_capacity_bytes()
    wbytes = _weights_vmem_bytes(L, C, D, buffers=1 if single_buffer_consts else 2)
    budget = max(int(0.5 * cap) - wbytes, 1 << 20)
    bt = batch_tile if batch_tile is not None else _pick_batch_tile(
        B, L, C, D, budget, _min_grid_steps(), flat_io)
    assert B % bt == 0, "batch_tile must divide B"
    grid = (B // bt,)

    # bf16 weights (halves weight DMA + VMEM); biases stay f32 for the epilogue.
    wdt = jnp.bfloat16
    tw1, tw2 = params["tw1"].astype(wdt), params["tw2"].astype(wdt)
    cw1, cw2 = params["cw1"].astype(wdt), params["cw2"].astype(wdt)

    # Constant-index operands: DMA'd once; single pipeline buffer when requested.
    def const_spec(shape):
        idx = lambda b: (0,) * len(shape)
        if single_buffer_consts:
            return pl.BlockSpec(shape, idx, pipeline_mode=pl.Buffered(1))
        return pl.BlockSpec(shape, idx)

    if flat_io:
        x_in = x.reshape(B, L * C)                       # free row-major reshape
        io_spec = pl.BlockSpec((bt, L * C), lambda b: (b, 0))
        out_shape = jax.ShapeDtypeStruct((B, L * C), x.dtype)
    else:
        x_in = x
        io_spec = pl.BlockSpec((bt, L, C), lambda b: (b, 0, 0))
        out_shape = jax.ShapeDtypeStruct((B, L, C), x.dtype)

    # Advisory cost estimate (HBM traffic counted dense; kernel is memory-bound
    # for realistic D, so small-K/N MXU efficiency is acceptable).
    flops = 8 * B * L * C * D
    bytes_accessed = int(2 * B * L * C * 4
                         + 2 * (2 * L * D + 2 * C * D)
                         + 4 * (2 * D + L + C))
    cost = pl.CostEstimate(flops=flops, transcendentals=0,
                           bytes_accessed=bytes_accessed)

    # Scoped-VMEM limit: enough for the padded working set + headroom, never
    # more than ~80% of the chip's physical per-core VMEM.
    need = wbytes + _step_vmem_bytes(bt, L, C, D, flat_io)
    vmem_limit = int(max(min(need + (16 << 20), int(0.8 * cap)), 32 << 20))
    vmem_limit = min(vmem_limit, cap)

    out = pl.pallas_call(
        _make_kernel(L, C, flat_io),
        out_shape=out_shape,
        grid_spec=pltpu.PrefetchScalarGridSpec(
            num_scalar_prefetch=0,
            grid=grid,
            in_specs=[
                io_spec,                                   # x batch tile
                const_spec((L, D)), const_spec((1, D)),    # temporal lin1
                const_spec((D, L)), const_spec((1, L)),    # temporal lin2
                const_spec((C, D)), const_spec((1, D)),    # channel lin1
                const_spec((D, C)), const_spec((1, C)),    # channel lin2
            ],
            out_specs=io_spec,
        ),
        compiler_params=pltpu.CompilerParams(
            dimension_semantics=("parallel",),
            vmem_limit_bytes=vmem_limit),
        cost_estimate=cost,
    )(x_in, tw1, params["tb1"], tw2, params["tb2"],
      cw1, params["cb1"], cw2, params["cb2"])

    return out.reshape(B, L, C) if flat_io else out


# --------------------------------------------------------------------------- #
# Reference, params, demo
# --------------------------------------------------------------------------- #
def resblock_ref(x, p):
    """Pure-JAX f32 reference matching the PyTorch forward (dropout = identity)."""
    xt = jnp.swapaxes(x, 1, 2)                                   # (B, C, L)
    h = jax.nn.relu(xt @ p["tw1"] + p["tb1"][0])
    t_out = h @ p["tw2"] + p["tb2"][0]                           # (B, C, L)
    x = x + jnp.swapaxes(t_out, 1, 2)
    h2 = jax.nn.relu(x @ p["cw1"] + p["cb1"][0])
    return x + h2 @ p["cw2"] + p["cb2"][0]


def make_params(key, seq_len, enc_in, d_model):
    ks = jax.random.split(key, 8)
    s = 0.1
    # Weights stored pre-transposed vs torch.nn.Linear ([out, in]) so y = x @ W + b.
    return {
        "tw1": s * jax.random.normal(ks[0], (seq_len, d_model), jnp.float32),
        "tb1": s * jax.random.normal(ks[1], (1, d_model), jnp.float32),
        "tw2": s * jax.random.normal(ks[2], (d_model, seq_len), jnp.float32),
        "tb2": s * jax.random.normal(ks[3], (1, seq_len), jnp.float32),
        "cw1": s * jax.random.normal(ks[4], (enc_in, d_model), jnp.float32),
        "cb1": s * jax.random.normal(ks[5], (1, d_model), jnp.float32),
        "cw2": s * jax.random.normal(ks[6], (d_model, enc_in), jnp.float32),
        "cb2": s * jax.random.normal(ks[7], (1, enc_in), jnp.float32),
    }


if __name__ == "__main__":
    B, L, C, D = 2, 16, 8, 32   # batch, seq_len, enc_in, d_model
    key = jax.random.PRNGKey(0)
    kx, kp = jax.random.split(key)
    x = jax.random.normal(kx, (B, L, C), jnp.float32)
    params = make_params(kp, L, C, D)

    # Preferred config first; degrade gracefully if a feature is unsupported
    # by the installed Pallas/Mosaic version (last config is the previously
    # validated layout).
    configs = (
        dict(flat_io=True, single_buffer_consts=True),
        dict(flat_io=True, single_buffer_consts=False),
        dict(flat_io=False, single_buffer_consts=False),
    )
    out, last_err = None, None
    for cfg in configs:
        try:
            out = jax.block_until_ready(resblock(x, params, **cfg))
            break
        except Exception as e:          # feature fallback
            last_err = e
    if out is None:
        raise last_err

    ref = resblock_ref(x, params)
    # bf16 matmul operands (f32 accumulate) vs f32 reference -> loosened tolerance.
    assert jnp.allclose(out, ref, atol=2e-2, rtol=2e-2), "mismatch vs reference"
    print("KERNEL_OK")
</pallas_src>

<mosaic_0001>
module attributes {stable_mosaic.version = 11 : i64} {
  func.func @kernel(%arg0: i32, %arg1: memref<2x128xf32, #tpu.memory_space<vmem>>, %arg2: memref<16x32xbf16, #tpu.memory_space<vmem>>, %arg3: memref<1x32xf32, #tpu.memory_space<vmem>>, %arg4: memref<32x16xbf16, #tpu.memory_space<vmem>>, %arg5: memref<1x16xf32, #tpu.memory_space<vmem>>, %arg6: memref<8x32xbf16, #tpu.memory_space<vmem>>, %arg7: memref<1x32xf32, #tpu.memory_space<vmem>>, %arg8: memref<32x8xbf16, #tpu.memory_space<vmem>>, %arg9: memref<1x8xf32, #tpu.memory_space<vmem>>, %arg10: memref<2x128xf32, #tpu.memory_space<vmem>>) attributes {dimension_semantics = [#tpu.dimension_semantics<parallel>], iteration_bounds = array<i64: 1>, scalar_prefetch = 0 : i64, scratch_operands = 0 : i64, tpu.core_type = #tpu.core_type<tc>, window_params = [{transform_indices = @transform_0, window_bounds = array<i64: 2, 128>}, {pipeline_mode = #tpu.pipeline_mode<synchronous>, transform_indices = @transform_1, window_bounds = array<i64: 16, 32>}, {pipeline_mode = #tpu.pipeline_mode<synchronous>, transform_indices = @transform_2, window_bounds = array<i64: 1, 32>}, {pipeline_mode = #tpu.pipeline_mode<synchronous>, transform_indices = @transform_3, window_bounds = array<i64: 32, 16>}, {pipeline_mode = #tpu.pipeline_mode<synchronous>, transform_indices = @transform_4, window_bounds = array<i64: 1, 16>}, {pipeline_mode = #tpu.pipeline_mode<synchronous>, transform_indices = @transform_5, window_bounds = array<i64: 8, 32>}, {pipeline_mode = #tpu.pipeline_mode<synchronous>, transform_indices = @transform_6, window_bounds = array<i64: 1, 32>}, {pipeline_mode = #tpu.pipeline_mode<synchronous>, transform_indices = @transform_7, window_bounds = array<i64: 32, 8>}, {pipeline_mode = #tpu.pipeline_mode<synchronous>, transform_indices = @transform_8, window_bounds = array<i64: 1, 8>}, {transform_indices = @transform_9, window_bounds = array<i64: 2, 128>}]} {
    %c0 = arith.constant 0 : index
    %c0_0 = arith.constant 0 : index
    %0 = vector.load %arg1[%c0, %c0_0] : memref<2x128xf32, #tpu.memory_space<vmem>>, vector<2x128xf32>
    %1 = vector.shape_cast %0 : vector<2x128xf32> to vector<2x16x8xf32>
    %2 = tpu.transpose %1, [0, 2, 1] : vector<2x16x8xf32> -> vector<2x8x16xf32>
    %3 = vector.shape_cast %2 : vector<2x8x16xf32> to vector<16x16xf32>
    %4 = arith.truncf %3 : vector<16x16xf32> to vector<16x16xbf16>
    %c0_1 = arith.constant 0 : index
    %c0_2 = arith.constant 0 : index
    %5 = vector.load %arg2[%c0_1, %c0_2] : memref<16x32xbf16, #tpu.memory_space<vmem>>, vector<16x32xbf16>
    %cst = arith.constant dense<0.000000e+00> : vector<16x32xf32>
    %6 = tpu.matmul %4, %5, %cst {dimension_numbers = #tpu.dot_dimension_numbers<[1], [0], [0], [1], [0, 0, 1, 1], [], []>} : vector<16x16xbf16>, vector<16x32xbf16>, vector<16x32xf32> -> vector<16x32xf32>
    %c0_3 = arith.constant 0 : index
    %c0_4 = arith.constant 0 : index
    %7 = vector.load %arg3[%c0_3, %c0_4] : memref<1x32xf32, #tpu.memory_space<vmem>>, vector<1x32xf32>
    %8 = vector.broadcast %7 : vector<1x32xf32> to vector<16x32xf32>
    %9 = arith.addf %6, %8 : vector<16x32xf32>
    %cst_5 = arith.constant 0.000000e+00 : f32
    %10 = vector.broadcast %cst_5 : f32 to vector<16x32xf32>
    %11 = arith.maximumf %9, %10 : vector<16x32xf32>
    %12 = arith.truncf %11 : vector<16x32xf32> to vector<16x32xbf16>
    %c0_6 = arith.constant 0 : index
    %c0_7 = arith.constant 0 : index
    %13 = vector.load %arg4[%c0_6, %c0_7] : memref<32x16xbf16, #tpu.memory_space<vmem>>, vector<32x16xbf16>
    %cst_8 = arith.constant dense<0.000000e+00> : vector<16x16xf32>
    %14 = tpu.matmul %12, %13, %cst_8 {dimension_numbers = #tpu.dot_dimension_numbers<[1], [0], [0], [1], [0, 0, 1, 1], [], []>} : vector<16x32xbf16>, vector<32x16xbf16>, vector<16x16xf32> -> vector<16x16xf32>
    %15 = arith.addf %3, %14 : vector<16x16xf32>
    %c0_9 = arith.constant 0 : index
    %c0_10 = arith.constant 0 : index
    %16 = vector.load %arg5[%c0_9, %c0_10] : memref<1x16xf32, #tpu.memory_space<vmem>>, vector<1x16xf32>
    %17 = vector.broadcast %16 : vector<1x16xf32> to vector<16x16xf32>
    %18 = arith.addf %15, %17 : vector<16x16xf32>
    %19 = vector.shape_cast %18 : vector<16x16xf32> to vector<2x8x16xf32>
    %20 = tpu.transpose %19, [0, 2, 1] : vector<2x8x16xf32> -> vector<2x16x8xf32>
    %21 = vector.shape_cast %20 : vector<2x16x8xf32> to vector<32x8xf32>
    %22 = arith.truncf %21 : vector<32x8xf32> to vector<32x8xbf16>
    %c0_11 = arith.constant 0 : index
    %c0_12 = arith.constant 0 : index
    %23 = vector.load %arg6[%c0_11, %c0_12] : memref<8x32xbf16, #tpu.memory_space<vmem>>, vector<8x32xbf16>
    %cst_13 = arith.constant dense<0.000000e+00> : vector<32x32xf32>
    %24 = tpu.matmul %22, %23, %cst_13 {dimension_numbers = #tpu.dot_dimension_numbers<[1], [0], [0], [1], [0, 0, 1, 1], [], []>} : vector<32x8xbf16>, vector<8x32xbf16>, vector<32x32xf32> -> vector<32x32xf32>
    %c0_14 = arith.constant 0 : index
    %c0_15 = arith.constant 0 : index
    %25 = vector.load %arg7[%c0_14, %c0_15] : memref<1x32xf32, #tpu.memory_space<vmem>>, vector<1x32xf32>
    %26 = vector.broadcast %25 : vector<1x32xf32> to vector<32x32xf32>
    %27 = arith.addf %24, %26 : vector<32x32xf32>
    %cst_16 = arith.constant 0.000000e+00 : f32
    %28 = vector.broadcast %cst_16 : f32 to vector<32x32xf32>
    %29 = arith.maximumf %27, %28 : vector<32x32xf32>
    %30 = arith.truncf %29 : vector<32x32xf32> to vector<32x32xbf16>
    %c0_17 = arith.constant 0 : index
    %c0_18 = arith.constant 0 : index
    %31 = vector.load %arg8[%c0_17, %c0_18] : memref<32x8xbf16, #tpu.memory_space<vmem>>, vector<32x8xbf16>
    %cst_19 = arith.constant dense<0.000000e+00> : vector<32x8xf32>
    %32 = tpu.matmul %30, %31, %cst_19 {dimension_numbers = #tpu.dot_dimension_numbers<[1], [0], [0], [1], [0, 0, 1, 1], [], []>} : vector<32x32xbf16>, vector<32x8xbf16>, vector<32x8xf32> -> vector<32x8xf32>
    %33 = arith.addf %21, %32 : vector<32x8xf32>
    %c0_20 = arith.constant 0 : index
    %c0_21 = arith.constant 0 : index
    %34 = vector.load %arg9[%c0_20, %c0_21] : memref<1x8xf32, #tpu.memory_space<vmem>>, vector<1x8xf32>
    %35 = vector.broadcast %34 : vector<1x8xf32> to vector<32x8xf32>
    %36 = arith.addf %33, %35 : vector<32x8xf32>
    %37 = vector.shape_cast %36 : vector<32x8xf32> to vector<2x128xf32>
    %c0_22 = arith.constant 0 : index
    %c0_23 = arith.constant 0 : index
    %38 = vector.load %arg10[%c0_22, %c0_23] : memref<2x128xf32, #tpu.memory_space<vmem>>, vector<2x128xf32>
    tpu.vector_store %arg10[%c0_22, %c0_23], %37 {strides = array<i32>} : memref<2x128xf32, #tpu.memory_space<vmem>>, vector<2x128xf32>,
    return
  }
  func.func @transform_0(%arg0: i32) -> (i32, i32) {
    %c0_i32 = arith.constant 0 : i32
    %c0_i32_0 = arith.constant 0 : i32
    return %arg0, %c0_i32 : i32, i32
  }
  func.func @transform_1(%arg0: i32) -> (i32, i32) {
    %c0_i32 = arith.constant 0 : i32
    %c0_i32_0 = arith.constant 0 : i32
    %c0_i32_1 = arith.constant 0 : i32
    return %c0_i32, %c0_i32_0 : i32, i32
  }
  func.func @transform_2(%arg0: i32) -> (i32, i32) {
    %c0_i32 = arith.constant 0 : i32
    %c0_i32_0 = arith.constant 0 : i32
    %c0_i32_1 = arith.constant 0 : i32
    return %c0_i32, %c0_i32_0 : i32, i32
  }
  func.func @transform_3(%arg0: i32) -> (i32, i32) {
    %c0_i32 = arith.constant 0 : i32
    %c0_i32_0 = arith.constant 0 : i32
    %c0_i32_1 = arith.constant 0 : i32
    return %c0_i32, %c0_i32_0 : i32, i32
  }
  func.func @transform_4(%arg0: i32) -> (i32, i32) {
    %c0_i32 = arith.constant 0 : i32
    %c0_i32_0 = arith.constant 0 : i32
    %c0_i32_1 = arith.constant 0 : i32
    return %c0_i32, %c0_i32_0 : i32, i32
  }
  func.func @transform_5(%arg0: i32) -> (i32, i32) {
    %c0_i32 = arith.constant 0 : i32
    %c0_i32_0 = arith.constant 0 : i32
    %c0_i32_1 = arith.constant 0 : i32
    return %c0_i32, %c0_i32_0 : i32, i32
  }
  func.func @transform_6(%arg0: i32) -> (i32, i32) {
    %c0_i32 = arith.constant 0 : i32
    %c0_i32_0 = arith.constant 0 : i32
    %c0_i32_1 = arith.constant 0 : i32
    return %c0_i32, %c0_i32_0 : i32, i32
  }
  func.func @transform_7(%arg0: i32) -> (i32, i32) {
    %c0_i32 = arith.constant 0 : i32
    %c0_i32_0 = arith.constant 0 : i32
    %c0_i32_1 = arith.constant 0 : i32
    return %c0_i32, %c0_i32_0 : i32, i32
  }
  func.func @transform_8(%arg0: i32) -> (i32, i32) {
    %c0_i32 = arith.constant 0 : i32
    %c0_i32_0 = arith.constant 0 : i32
    %c0_i32_1 = arith.constant 0 : i32
    return %c0_i32, %c0_i32_0 : i32, i32
  }
  func.func @transform_9(%arg0: i32) -> (i32, i32) {
    %c0_i32 = arith.constant 0 : i32
    %c0_i32_0 = arith.constant 0 : i32
    return %arg0, %c0_i32 : i32, i32
  }
}

module attributes {stable_mosaic.version = 11 : i64} {
  func.func @kernel(%arg0: i32, %arg1: memref<2x128xf32, #tpu.memory_space<vmem>>, %arg2: memref<16x32xbf16, #tpu.memory_space<vmem>>, %arg3: memref<1x32xf32, #tpu.memory_space<vmem>>, %arg4: memref<32x16xbf16, #tpu.memory_space<vmem>>, %arg5: memref<1x16xf32, #tpu.memory_space<vmem>>, %arg6: memref<8x32xbf16, #tpu.memory_space<vmem>>, %arg7: memref<1x32xf32, #tpu.memory_space<vmem>>, %arg8: memref<32x8xbf16, #tpu.memory_space<vmem>>, %arg9: memref<1x8xf32, #tpu.memory_space<vmem>>, %arg10: memref<2x128xf32, #tpu.memory_space<vmem>>) attributes {dimension_semantics = [#tpu.dimension_semantics<parallel>], iteration_bounds = array<i64: 1>, scalar_prefetch = 0 : i64, scratch_operands = 0 : i64, tpu.core_type = #tpu.core_type<tc>, window_params = [{transform_indices = @transform_0, window_bounds = array<i64: 2, 128>}, {pipeline_mode = #tpu.pipeline_mode<synchronous>, transform_indices = @transform_1, window_bounds = array<i64: 16, 32>}, {pipeline_mode = #tpu.pipeline_mode<synchronous>, transform_indices = @transform_2, window_bounds = array<i64: 1, 32>}, {pipeline_mode = #tpu.pipeline_mode<synchronous>, transform_indices = @transform_3, window_bounds = array<i64: 32, 16>}, {pipeline_mode = #tpu.pipeline_mode<synchronous>, transform_indices = @transform_4, window_bounds = array<i64: 1, 16>}, {pipeline_mode = #tpu.pipeline_mode<synchronous>, transform_indices = @transform_5, window_bounds = array<i64: 8, 32>}, {pipeline_mode = #tpu.pipeline_mode<synchronous>, transform_indices = @transform_6, window_bounds = array<i64: 1, 32>}, {pipeline_mode = #tpu.pipeline_mode<synchronous>, transform_indices = @transform_7, window_bounds = array<i64: 32, 8>}, {pipeline_mode = #tpu.pipeline_mode<synchronous>, transform_indices = @transform_8, window_bounds = array<i64: 1, 8>}, {transform_indices = @transform_9, window_bounds = array<i64: 2, 128>}]} {
    %c0 = arith.constant 0 : index
    %c0_0 = arith.constant 0 : index
    %0 = vector.load %arg1[%c0, %c0_0] : memref<2x128xf32, #tpu.memory_space<vmem>>, vector<2x128xf32>
    %1 = vector.shape_cast %0 : vector<2x128xf32> to vector<2x16x8xf32>
    %2 = tpu.transpose %1, [0, 2, 1] : vector<2x16x8xf32> -> vector<2x8x16xf32>
    %3 = vector.shape_cast %2 : vector<2x8x16xf32> to vector<16x16xf32>
    %4 = arith.truncf %3 : vector<16x16xf32> to vector<16x16xbf16>
    %c0_1 = arith.constant 0 : index
    %c0_2 = arith.constant 0 : index
    %5 = vector.load %arg2[%c0_1, %c0_2] : memref<16x32xbf16, #tpu.memory_space<vmem>>, vector<16x32xbf16>
    %cst = arith.constant dense<0.000000e+00> : vector<16x32xf32>
    %6 = tpu.matmul %4, %5, %cst {dimension_numbers = #tpu.dot_dimension_numbers<[1], [0], [0], [1], [0, 0, 1, 1], [], []>} : vector<16x16xbf16>, vector<16x32xbf16>, vector<16x32xf32> -> vector<16x32xf32>
    %c0_3 = arith.constant 0 : index
    %c0_4 = arith.constant 0 : index
    %7 = vector.load %arg3[%c0_3, %c0_4] : memref<1x32xf32, #tpu.memory_space<vmem>>, vector<1x32xf32>
    %8 = vector.broadcast %7 : vector<1x32xf32> to vector<16x32xf32>
    %9 = arith.addf %6, %8 : vector<16x32xf32>
    %cst_5 = arith.constant 0.000000e+00 : f32
    %10 = vector.broadcast %cst_5 : f32 to vector<16x32xf32>
    %11 = arith.maximumf %9, %10 : vector<16x32xf32>
    %12 = arith.truncf %11 : vector<16x32xf32> to vector<16x32xbf16>
    %c0_6 = arith.constant 0 : index
    %c0_7 = arith.constant 0 : index
    %13 = vector.load %arg4[%c0_6, %c0_7] : memref<32x16xbf16, #tpu.memory_space<vmem>>, vector<32x16xbf16>
    %cst_8 = arith.constant dense<0.000000e+00> : vector<16x16xf32>
    %14 = tpu.matmul %12, %13, %cst_8 {dimension_numbers = #tpu.dot_dimension_numbers<[1], [0], [0], [1], [0, 0, 1, 1], [], []>} : vector<16x32xbf16>, vector<32x16xbf16>, vector<16x16xf32> -> vector<16x16xf32>
    %15 = arith.addf %3, %14 : vector<16x16xf32>
    %c0_9 = arith.constant 0 : index
    %c0_10 = arith.constant 0 : index
    %16 = vector.load %arg5[%c0_9, %c0_10] : memref<1x16xf32, #tpu.memory_space<vmem>>, vector<1x16xf32>
    %17 = vector.broadcast %16 : vector<1x16xf32> to vector<16x16xf32>
    %18 = arith.addf %15, %17 : vector<16x16xf32>
    %19 = vector.shape_cast %18 : vector<16x16xf32> to vector<2x8x16xf32>
    %20 = tpu.transpose %19, [0, 2, 1] : vector<2x8x16xf32> -> vector<2x16x8xf32>
    %21 = vector.shape_cast %20 : vector<2x16x8xf32> to vector<32x8xf32>
    %22 = arith.truncf %21 : vector<32x8xf32> to vector<32x8xbf16>
    %c0_11 = arith.constant 0 : index
    %c0_12 = arith.constant 0 : index
    %23 = vector.load %arg6[%c0_11, %c0_12] : memref<8x32xbf16, #tpu.memory_space<vmem>>, vector<8x32xbf16>
    %cst_13 = arith.constant dense<0.000000e+00> : vector<32x32xf32>
    %24 = tpu.matmul %22, %23, %cst_13 {dimension_numbers = #tpu.dot_dimension_numbers<[1], [0], [0], [1], [0, 0, 1, 1], [], []>} : vector<32x8xbf16>, vector<8x32xbf16>, vector<32x32xf32> -> vector<32x32xf32>
    %c0_14 = arith.constant 0 : index
    %c0_15 = arith.constant 0 : index
    %25 = vector.load %arg7[%c0_14, %c0_15] : memref<1x32xf32, #tpu.memory_space<vmem>>, vector<1x32xf32>
    %26 = vector.broadcast %25 : vector<1x32xf32> to vector<32x32xf32>
    %27 = arith.addf %24, %26 : vector<32x32xf32>
    %cst_16 = arith.constant 0.000000e+00 : f32
    %28 = vector.broadcast %cst_16 : f32 to vector<32x32xf32>
    %29 = arith.maximumf %27, %28 : vector<32x32xf32>
    %30 = arith.truncf %29 : vector<32x32xf32> to vector<32x32xbf16>
    %c0_17 = arith.constant 0 : index
    %c0_18 = arith.constant 0 : index
    %31 = vector.load %arg8[%c0_17, %c0_18] : memref<32x8xbf16, #tpu.memory_space<vmem>>, vector<32x8xbf16>
    %cst_19 = arith.constant dense<0.000000e+00> : vector<32x8xf32>
    %32 = tpu.matmul %30, %31, %cst_19 {dimension_numbers = #tpu.dot_dimension_numbers<[1], [0], [0], [1], [0, 0, 1, 1], [], []>} : vector<32x32xbf16>, vector<32x8xbf16>, vector<32x8xf32> -> vector<32x8xf32>
    %33 = arith.addf %21, %32 : vector<32x8xf32>
    %c0_20 = arith.constant 0 : index
    %c0_21 = arith.constant 0 : index
    %34 = vector.load %arg9[%c0_20, %c0_21] : memref<1x8xf32, #tpu.memory_space<vmem>>, vector<1x8xf32>
    %35 = vector.broadcast %34 : vector<1x8xf32> to vector<32x8xf32>
    %36 = arith.addf %33, %35 : vector<32x8xf32>
    %37 = vector.shape_cast %36 : vector<32x8xf32> to vector<2x128xf32>
    %c0_22 = arith.constant 0 : index
    %c0_23 = arith.constant 0 : index
    %38 = vector.load %arg10[%c0_22, %c0_23] : memref<2x128xf32, #tpu.memory_space<vmem>>, vector<2x128xf32>
    tpu.vector_store %arg10[%c0_22, %c0_23], %37 {strides = array<i32>} : memref<2x128xf32, #tpu.memory_space<vmem>>, vector<2x128xf32>,
    return
  }
  func.func @transform_0(%arg0: i32) -> (i32, i32) {
    %c0_i32 = arith.constant 0 : i32
    %c0_i32_0 = arith.constant 0 : i32
    return %arg0, %c0_i32 : i32, i32
  }
  func.func @transform_1(%arg0: i32) -> (i32, i32) {
    %c0_i32 = arith.constant 0 : i32
    %c0_i32_0 = arith.constant 0 : i32
    %c0_i32_1 = arith.constant 0 : i32
    return %c0_i32, %c0_i32_0 : i32, i32
  }
  func.func @transform_2(%arg0: i32) -> (i32, i32) {
    %c0_i32 = arith.constant 0 : i32
    %c0_i32_0 = arith.constant 0 : i32
    %c0_i32_1 = arith.constant 0 : i32
    return %c0_i32, %c0_i32_0 : i32, i32
  }
  func.func @transform_3(%arg0: i32) -> (i32, i32) {
    %c0_i32 = arith.constant 0 : i32
    %c0_i32_0 = arith.constant 0 : i32
    %c0_i32_1 = arith.constant 0 : i32
    return %c0_i32, %c0_i32_0 : i32, i32
  }
  func.func @transform_4(%arg0: i32) -> (i32, i32) {
    %c0_i32 = arith.constant 0 : i32
    %c0_i32_0 = arith.constant 0 : i32
    %c0_i32_1 = arith.constant 0 : i32
    return %c0_i32, %c0_i32_0 : i32, i32
  }
  func.func @transform_5(%arg0: i32) -> (i32, i32) {
    %c0_i32 = arith.constant 0 : i32
    %c0_i32_0 = arith.constant 0 : i32
    %c0_i32_1 = arith.constant 0 : i32
    return %c0_i32, %c0_i32_0 : i32, i32
  }
  func.func @transform_6(%arg0: i32) -> (i32, i32) {
    %c0_i32 = arith.constant 0 : i32
    %c0_i32_0 = arith.constant 0 : i32
    %c0_i32_1 = arith.constant 0 : i32
    return %c0_i32, %c0_i32_0 : i32, i32
  }
  func.func @transform_7(%arg0: i32) -> (i32, i32) {
    %c0_i32 = arith.constant 0 : i32
    %c0_i32_0 = arith.constant 0 : i32
    %c0_i32_1 = arith.constant 0 : i32
    return %c0_i32, %c0_i32_0 : i32, i32
  }
  func.func @transform_8(%arg0: i32) -> (i32, i32) {
    %c0_i32 = arith.constant 0 : i32
    %c0_i32_0 = arith.constant 0 : i32
    %c0_i32_1 = arith.constant 0 : i32
    return %c0_i32, %c0_i32_0 : i32, i32
  }
  func.func @transform_9(%arg0: i32) -> (i32, i32) {
    %c0_i32 = arith.constant 0 : i32
    %c0_i32_0 = arith.constant 0 : i32
    return %arg0, %c0_i32 : i32, i32
  }
}

module attributes {stable_mosaic.version = 11 : i64} {
  func.func @kernel(%arg0: i32, %arg1: memref<2x16x8xf32, #tpu.memory_space<vmem>>, %arg2: memref<16x32xbf16, #tpu.memory_space<vmem>>, %arg3: memref<1x32xf32, #tpu.memory_space<vmem>>, %arg4: memref<32x16xbf16, #tpu.memory_space<vmem>>, %arg5: memref<1x16xf32, #tpu.memory_space<vmem>>, %arg6: memref<8x32xbf16, #tpu.memory_space<vmem>>, %arg7: memref<1x32xf32, #tpu.memory_space<vmem>>, %arg8: memref<32x8xbf16, #tpu.memory_space<vmem>>, %arg9: memref<1x8xf32, #tpu.memory_space<vmem>>, %arg10: memref<2x16x8xf32, #tpu.memory_space<vmem>>) attributes {dimension_semantics = [#tpu.dimension_semantics<parallel>], iteration_bounds = array<i64: 1>, scalar_prefetch = 0 : i64, scratch_operands = 0 : i64, tpu.core_type = #tpu.core_type<tc>, window_params = [{transform_indices = @transform_0, window_bounds = array<i64: 2, 16, 8>}, {pipeline_mode = #tpu.pipeline_mode<synchronous>, transform_indices = @transform_1, window_bounds = array<i64: 16, 32>}, {pipeline_mode = #tpu.pipeline_mode<synchronous>, transform_indices = @transform_2, window_bounds = array<i64: 1, 32>}, {pipeline_mode = #tpu.pipeline_mode<synchronous>, transform_indices = @transform_3, window_bounds = array<i64: 32, 16>}, {pipeline_mode = #tpu.pipeline_mode<synchronous>, transform_indices = @transform_4, window_bounds = array<i64: 1, 16>}, {pipeline_mode = #tpu.pipeline_mode<synchronous>, transform_indices = @transform_5, window_bounds = array<i64: 8, 32>}, {pipeline_mode = #tpu.pipeline_mode<synchronous>, transform_indices = @transform_6, window_bounds = array<i64: 1, 32>}, {pipeline_mode = #tpu.pipeline_mode<synchronous>, transform_indices = @transform_7, window_bounds = array<i64: 32, 8>}, {pipeline_mode = #tpu.pipeline_mode<synchronous>, transform_indices = @transform_8, window_bounds = array<i64: 1, 8>}, {transform_indices = @transform_9, window_bounds = array<i64: 2, 16, 8>}]} {
    %c0 = arith.constant 0 : index
    %c0_0 = arith.constant 0 : index
    %c0_1 = arith.constant 0 : index
    %0 = vector.load %arg1[%c0, %c0_0, %c0_1] : memref<2x16x8xf32, #tpu.memory_space<vmem>>, vector<2x16x8xf32>
    %1 = tpu.transpose %0, [0, 2, 1] : vector<2x16x8xf32> -> vector<2x8x16xf32>
    %2 = vector.shape_cast %1 : vector<2x8x16xf32> to vector<16x16xf32>
    %3 = arith.truncf %2 : vector<16x16xf32> to vector<16x16xbf16>
    %c0_2 = arith.constant 0 : index
    %c0_3 = arith.constant 0 : index
    %4 = vector.load %arg2[%c0_2, %c0_3] : memref<16x32xbf16, #tpu.memory_space<vmem>>, vector<16x32xbf16>
    %cst = arith.constant dense<0.000000e+00> : vector<16x32xf32>
    %5 = tpu.matmul %3, %4, %cst {dimension_numbers = #tpu.dot_dimension_numbers<[1], [0], [0], [1], [0, 0, 1, 1], [], []>} : vector<16x16xbf16>, vector<16x32xbf16>, vector<16x32xf32> -> vector<16x32xf32>
    %c0_4 = arith.constant 0 : index
    %c0_5 = arith.constant 0 : index
    %6 = vector.load %arg3[%c0_4, %c0_5] : memref<1x32xf32, #tpu.memory_space<vmem>>, vector<1x32xf32>
    %7 = vector.broadcast %6 : vector<1x32xf32> to vector<16x32xf32>
    %8 = arith.addf %5, %7 : vector<16x32xf32>
    %cst_6 = arith.constant 0.000000e+00 : f32
    %9 = vector.broadcast %cst_6 : f32 to vector<16x32xf32>
    %10 = arith.maximumf %8, %9 : vector<16x32xf32>
    %11 = arith.truncf %10 : vector<16x32xf32> to vector<16x32xbf16>
    %c0_7 = arith.constant 0 : index
    %c0_8 = arith.constant 0 : index
    %12 = vector.load %arg4[%c0_7, %c0_8] : memref<32x16xbf16, #tpu.memory_space<vmem>>, vector<32x16xbf16>
    %cst_9 = arith.constant dense<0.000000e+00> : vector<16x16xf32>
    %13 = tpu.matmul %11, %12, %cst_9 {dimension_numbers = #tpu.dot_dimension_numbers<[1], [0], [0], [1], [0, 0, 1, 1], [], []>} : vector<16x32xbf16>, vector<32x16xbf16>, vector<16x16xf32> -> vector<16x16xf32>
    %14 = arith.addf %2, %13 : vector<16x16xf32>
    %c0_10 = arith.constant 0 : index
    %c0_11 = arith.constant 0 : index
    %15 = vector.load %arg5[%c0_10, %c0_11] : memref<1x16xf32, #tpu.memory_space<vmem>>, vector<1x16xf32>
    %16 = vector.broadcast %15 : vector<1x16xf32> to vector<16x16xf32>
    %17 = arith.addf %14, %16 : vector<16x16xf32>
    %18 = vector.shape_cast %17 : vector<16x16xf32> to vector<2x8x16xf32>
    %19 = tpu.transpose %18, [0, 2, 1] : vector<2x8x16xf32> -> vector<2x16x8xf32>
    %20 = vector.shape_cast %19 : vector<2x16x8xf32> to vector<32x8xf32>
    %21 = arith.truncf %20 : vector<32x8xf32> to vector<32x8xbf16>
    %c0_12 = arith.constant 0 : index
    %c0_13 = arith.constant 0 : index
    %22 = vector.load %arg6[%c0_12, %c0_13] : memref<8x32xbf16, #tpu.memory_space<vmem>>, vector<8x32xbf16>
    %cst_14 = arith.constant dense<0.000000e+00> : vector<32x32xf32>
    %23 = tpu.matmul %21, %22, %cst_14 {dimension_numbers = #tpu.dot_dimension_numbers<[1], [0], [0], [1], [0, 0, 1, 1], [], []>} : vector<32x8xbf16>, vector<8x32xbf16>, vector<32x32xf32> -> vector<32x32xf32>
    %c0_15 = arith.constant 0 : index
    %c0_16 = arith.constant 0 : index
    %24 = vector.load %arg7[%c0_15, %c0_16] : memref<1x32xf32, #tpu.memory_space<vmem>>, vector<1x32xf32>
    %25 = vector.broadcast %24 : vector<1x32xf32> to vector<32x32xf32>
    %26 = arith.addf %23, %25 : vector<32x32xf32>
    %cst_17 = arith.constant 0.000000e+00 : f32
    %27 = vector.broadcast %cst_17 : f32 to vector<32x32xf32>
    %28 = arith.maximumf %26, %27 : vector<32x32xf32>
    %29 = arith.truncf %28 : vector<32x32xf32> to vector<32x32xbf16>
    %c0_18 = arith.constant 0 : index
    %c0_19 = arith.constant 0 : index
    %30 = vector.load %arg8[%c0_18, %c0_19] : memref<32x8xbf16, #tpu.memory_space<vmem>>, vector<32x8xbf16>
    %cst_20 = arith.constant dense<0.000000e+00> : vector<32x8xf32>
    %31 = tpu.matmul %29, %30, %cst_20 {dimension_numbers = #tpu.dot_dimension_numbers<[1], [0], [0], [1], [0, 0, 1, 1], [], []>} : vector<32x32xbf16>, vector<32x8xbf16>, vector<32x8xf32> -> vector<32x8xf32>
    %32 = arith.addf %20, %31 : vector<32x8xf32>
    %c0_21 = arith.constant 0 : index
    %c0_22 = arith.constant 0 : index
    %33 = vector.load %arg9[%c0_21, %c0_22] : memref<1x8xf32, #tpu.memory_space<vmem>>, vector<1x8xf32>
    %34 = vector.broadcast %33 : vector<1x8xf32> to vector<32x8xf32>
    %35 = arith.addf %32, %34 : vector<32x8xf32>
    %36 = vector.shape_cast %35 : vector<32x8xf32> to vector<2x16x8xf32>
    %c0_23 = arith.constant 0 : index
    %c0_24 = arith.constant 0 : index
    %c0_25 = arith.constant 0 : index
    %37 = vector.load %arg10[%c0_23, %c0_24, %c0_25] : memref<2x16x8xf32, #tpu.memory_space<vmem>>, vector<2x16x8xf32>
    tpu.vector_store %arg10[%c0_23, %c0_24, %c0_25], %36 {strides = array<i32>} : memref<2x16x8xf32, #tpu.memory_space<vmem>>, vector<2x16x8xf32>,
    return
  }
  func.func @transform_0(%arg0: i32) -> (i32, i32, i32) {
    %c0_i32 = arith.constant 0 : i32
    %c0_i32_0 = arith.constant 0 : i32
    %c0_i32_1 = arith.constant 0 : i32
    return %arg0, %c0_i32, %c0_i32_0 : i32, i32, i32
  }
  func.func @transform_1(%arg0: i32) -> (i32, i32) {
    %c0_i32 = arith.constant 0 : i32
    %c0_i32_0 = arith.constant 0 : i32
    %c0_i32_1 = arith.constant 0 : i32
    return %c0_i32, %c0_i32_0 : i32, i32
  }
  func.func @transform_2(%arg0: i32) -> (i32, i32) {
    %c0_i32 = arith.constant 0 : i32
    %c0_i32_0 = arith.constant 0 : i32
    %c0_i32_1 = arith.constant 0 : i32
    return %c0_i32, %c0_i32_0 : i32, i32
  }
  func.func @transform_3(%arg0: i32) -> (i32, i32) {
    %c0_i32 = arith.constant 0 : i32
    %c0_i32_0 = arith.constant 0 : i32
    %c0_i32_1 = arith.constant 0 : i32
    return %c0_i32, %c0_i32_0 : i32, i32
  }
  func.func @transform_4(%arg0: i32) -> (i32, i32) {
    %c0_i32 = arith.constant 0 : i32
    %c0_i32_0 = arith.constant 0 : i32
    %c0_i32_1 = arith.constant 0 : i32
    return %c0_i32, %c0_i32_0 : i32, i32
  }
  func.func @transform_5(%arg0: i32) -> (i32, i32) {
    %c0_i32 = arith.constant 0 : i32
    %c0_i32_0 = arith.constant 0 : i32
    %c0_i32_1 = arith.constant 0 : i32
    return %c0_i32, %c0_i32_0 : i32, i32
  }
  func.func @transform_6(%arg0: i32) -> (i32, i32) {
    %c0_i32 = arith.constant 0 : i32
    %c0_i32_0 = arith.constant 0 : i32
    %c0_i32_1 = arith.constant 0 : i32
    return %c0_i32, %c0_i32_0 : i32, i32
  }
  func.func @transform_7(%arg0: i32) -> (i32, i32) {
    %c0_i32 = arith.constant 0 : i32
    %c0_i32_0 = arith.constant 0 : i32
    %c0_i32_1 = arith.constant 0 : i32
    return %c0_i32, %c0_i32_0 : i32, i32
  }
  func.func @transform_8(%arg0: i32) -> (i32, i32) {
    %c0_i32 = arith.constant 0 : i32
    %c0_i32_0 = arith.constant 0 : i32
    %c0_i32_1 = arith.constant 0 : i32
    return %c0_i32, %c0_i32_0 : i32, i32
  }
  func.func @transform_9(%arg0: i32) -> (i32, i32, i32) {
    %c0_i32 = arith.constant 0 : i32
    %c0_i32_0 = arith.constant 0 : i32
    %c0_i32_1 = arith.constant 0 : i32
    return %arg0, %c0_i32, %c0_i32_0 : i32, i32, i32
  }
}

</mosaic_0001>

<bundles_post_ra>
// kernel: tpu_custom_call.1
= control target key start
LH: loop header
LB: loop body
LE: loop exit
PB: predicated region body
PF: predicated region fallthrough
CT: control target
= control target key end

     0   :  { %vm114_vm0 = vcmask 130048   ;;  %vm151_vm1 = vcmask 261120   ;;  %vm255_vm2 = vcmask 1043456   ;;  %vm248_vm3 = vcmask 64512   ;;  %s496_s0 = inlined_call_operand.vmem [shape: f32[2,16,8], index: 0, kind: input, shape index: {}]   ;;  %s497_s1 = inlined_call_operand.vmem [shape: bf16[16,32], index: 1, kind: input, shape index: {}]   ;;  %s498_s2 = inlined_call_operand.vmem [shape: f32[1,32], index: 2, kind: input, shape index: {}]   ;;  %s499_s3 = inlined_call_operand.vmem [shape: bf16[32,16], index: 3, kind: input, shape index: {}]   ;;  %s500_s4 = inlined_call_operand.vmem [shape: f32[1,16], index: 4, kind: input, shape index: {}]   ;;  %s501_s6 = inlined_call_operand.vmem [shape: f32[1,32], index: 6, kind: input, shape index: {}]   ;;  %s502_s5 = inlined_call_operand.vmem [shape: bf16[8,32], index: 5, kind: input, shape index: {}]   ;;  %s503_s8 = inlined_call_operand.vmem [shape: f32[1,8], index: 8, kind: input, shape index: {}]   ;;  %s504_s7 = inlined_call_operand.vmem [shape: bf16[32,8], index: 7, kind: input, shape index: {}]   ;;  %s505_s9 = inlined_call_operand.vmem [shape: f32[2,16,8], index: 9, kind: output, shape index: {}]  }
   0x1   :  { %v35_v0 = vld [vmem:[%s496_s0 + $0x10] sm:$0xff]  ;;  %v33_v1 = vld [vmem:[%s496_s0] sm:$0xff]  ;;  %v36_v3 = vld [vmem:[%s496_s0 + $0x18] sm:$0xff] }
   0x2   :  { %69 = vxpose.xlu1.b32.start [1/2] (short) (narrow) %v35_v0, 8  ;;  %37 = vxpose.xlu0.b32.start [1/2] (short) (narrow) %v33_v1, 8  ;;  %v371_v2 = vld [vmem:[%s497_s1] sm:$0xff]  ;;  %v34_v4 = vld [vmem:[%s496_s0 + $0x8] sm:$0xff] }
   0x3   :  { %125 = vmatpush.bf16.msra.mxu0 %v371_v2  ;;  %v373_v8 = vld [vmem:[%s499_s3 + $0x8] sm:$0xff]  ;;  %v372_v9 = vld [vmem:[%s499_s3] sm:$0xff] }
   0x4   :  { %161 = vmatpush.bf16.msra.mxu1 %v373_v8  ;;  %v379_v11 = vld [vmem:[%s498_s2] ss:$0 sm:$0xff]  ;;  %v375_v33 = vld [vmem:[%s504_s7 + $0x8] sm:$0xff] }
   0x5   :  { %v380_v18 = vld [vmem:[%s500_s4] ss:$0 sm:$0xff]  ;;  %376 = vmatpush.bf16.msra.mxu3 %v375_v33 }
   0x6   :  { %v243_v25 = vld [vmem:[%s502_s5] sm:$0xf] }
   0x7   :  { %v257_v26 = vsel %vm255_vm2, %v243_v25, 0  ;;  %312 = vmatpush.bf16.msrb.mxu0 %v375_v33  ;;  %v374_v34 = vld [vmem:[%s504_s7] sm:$0xff] }
   0x8   :  { %162 = vmatpush.bf16.msra.mxu1 %v372_v9  ;;  %266 = vmatpush.bf16.msra.mxu2 %v257_v26  ;;  %v381_v36 = vld [vmem:[%s501_s6] ss:$0 sm:$0xff] }
   0x9   :  { %377 = vmatpush.bf16.msra.mxu3 %v374_v34  ;;  %v382_v50 = vld [vmem:[%s503_s8] ss:$0 sm:$0xff] }
   0xa   :  { %70 = vxpose.xlu1.b32.end [2/2] (short) (narrow) %v36_v3, 8  ;;  %38 = vxpose.xlu0.b32.end [2/2] (short) (narrow) %v34_v4, 8 }
   0xb   :  { %313 = vmatpush.bf16.msrb.mxu0 %v374_v34 }
  0xa6   :  { %v85_v5 = vpop.trf.xlu1  ;;  %v53_v6 = vpop.trf.xlu0 }
  0xa7   :  { %v101_v7 = vpack.c.bf16 %v85_v5, %v53_v6 }
  0xa9   :  { %349 = vmatmul.msk.bf16.vlgmr.msra.gmra.mxu0 %vm114_vm0, %v101_v7 }
 0x126   :  { %v127_v10 = vpop.f32.mrf.mxu0 }
 0x127   :  { %v128_v12 = vadd.f32 %v379_v11, %v127_v10 }
 0x129   :  { %v132_v15 = vmax.f32 %v128_v12, 0.0 }
 0x12e   :  { %v129_v13 = vpop.f32.mrf.mxu0 }
 0x12f   :  { %v130_v14 = vadd.f32 %v379_v11, %v129_v13 }
 0x131   :  { %v133_v16 = vmax.f32 %v130_v14, 0.0 }
 0x133   :  { %v134_v17 = vpack.c.bf16 %v133_v16, %v132_v15 }
 0x135   :  { %358 = vmatmul.msk.bf16.vlgmr.msra.gmra.mxu1 %vm151_vm1, %v134_v17 }
 0x1b2   :  { %v164_v19 = vpop.f32.mrf.mxu1 }
 0x1b3   :  { %v169_v20 = vadd.f32 %v164_v19, %v53_v6 }
 0x1b5   :  { %v175_v21 = vadd.f32 %v380_v18, %v169_v20 }
 0x1b7   :  { %177 = vxpose.xlu2.b32.start.end [1/1] (short) (narrow) %v175_v21, 16 }
 0x1ba   :  { %v166_v22 = vpop.f32.mrf.mxu1 }
 0x1bb   :  { %v170_v23 = vadd.f32 %v166_v22, %v85_v5 }
 0x1bd   :  { %v176_v24 = vadd.f32 %v380_v18, %v170_v23 }
 0x1c7   :  { %209 = vxpose.xlu2.b32.start.end [1/1] (short) (narrow) %v176_v24, 16 }
 0x250   :  { %v193_v27 = vpop.trf.xlu2 }
 0x258   :  { %v194_v28 = vpop.trf.xlu2 }
 0x259   :  { %v241_v29 = vpack.c.bf16 %v194_v28, %v193_v27 }
 0x25b   :  { %359 = vmatmul.msk.bf16.vlgmr.msra.gmra.mxu2 %vm248_vm3, %v241_v29 }
 0x260   :  { %v225_v30 = vpop.trf.xlu2 }
 0x268   :  { %v226_v31 = vpop.trf.xlu2 }
 0x269   :  { %v242_v32 = vpack.c.bf16 %v226_v31, %v225_v30 }
 0x26b   :  { %360 = vmatmul.msk.bf16.gmra.mxu2 %vm248_vm3, %v242_v32 }
 0x2de   :  { %v268_v35 = vpop.f32.mrf.mxu2 }
 0x2df   :  { %v269_v37 = vadd.f32 %v381_v36, %v268_v35 }
 0x2e1   :  { %v278_v40 = vmax.f32 %v269_v37, 0.0 }
 0x2e6   :  { %v270_v38 = vpop.f32.mrf.mxu2 }
 0x2e7   :  { %v271_v39 = vadd.f32 %v381_v36, %v270_v38 }
 0x2e9   :  { %v279_v41 = vmax.f32 %v271_v39, 0.0 }
 0x2eb   :  { %v282_v42 = vpack.c.bf16 %v279_v41, %v278_v40 }
 0x2ed   :  { %369 = vmatmul.msk.bf16.vlgmr.msrb.gmra.mxu0 %vm151_vm1, %v282_v42 }
 0x2ee   :  { %v273_v43 = vpop.f32.mrf.mxu2 }
 0x2ef   :  { %v274_v44 = vadd.f32 %v381_v36, %v273_v43 }
 0x2f1   :  { %v280_v47 = vmax.f32 %v274_v44, 0.0 }
 0x2f6   :  { %v275_v45 = vpop.f32.mrf.mxu2 }
 0x2f7   :  { %v276_v46 = vadd.f32 %v381_v36, %v275_v45 }
 0x2f9   :  { %v281_v48 = vmax.f32 %v276_v46, 0.0 }
 0x2fb   :  { %v283_v49 = vpack.c.bf16 %v281_v48, %v280_v47 }
 0x2fd   :  { %370 = vmatmul.msk.bf16.vlgmr.msra.gmra.mxu3 %vm151_vm1, %v283_v49 }
 0x36a   :  { %v315_v51 = vpop.f32.mrf.mxu0 }
 0x36b   :  { %v325_v52 = vadd.f32 %v315_v51, %v193_v27 }
 0x36d   :  { %v333_v53 = vadd.f32 %v382_v50, %v325_v52 }
 0x36f   :  { %337 = vst.msk [vmem:[%s505_s9] sm:$0xff] %vm248_vm3, %v333_v53 }
 0x372   :  { %v317_v54 = vpop.f32.mrf.mxu0 }
 0x373   :  { %v326_v55 = vadd.f32 %v317_v54, %v194_v28 }
 0x375   :  { %v334_v56 = vadd.f32 %v382_v50, %v326_v55 }
 0x377   :  { %338 = vst.msk [vmem:[%s505_s9 + $0x8] sm:$0xff] %vm248_vm3, %v334_v56 }
 0x380   :  { %v320_v57 = vpop.f32.mrf.mxu3 }
 0x381   :  { %v327_v58 = vadd.f32 %v320_v57, %v225_v30 }
 0x383   :  { %v335_v59 = vadd.f32 %v382_v50, %v327_v58 }
 0x385   :  { %339 = vst.msk [vmem:[%s505_s9 + $0x10] sm:$0xff] %vm248_vm3, %v335_v59 }
 0x388   :  { %v322_v60 = vpop.f32.mrf.mxu3 }
 0x389   :  { %v328_v61 = vadd.f32 %v322_v60, %v226_v31 }
 0x38b   :  { %v336_v62 = vadd.f32 %v382_v50, %v328_v61 }
 0x38d   :  { %340 = vst.msk [vmem:[%s505_s9 + $0x18] sm:$0xff] %vm248_vm3, %v336_v62 }

</bundles_post_ra>
